<compile_context>
chip_gen: v7x
topology: tpu7x:2x2x1
jax: 0.10.0
libtpu: 0.0.40
codegen_flags: <defaults>
</compile_context>

<pallas_src>
import jax
import jax.numpy as jnp
from jax.experimental import pallas as pl
from jax.experimental.pallas import tpu as pltpu

_LANE = 128


def _fused_linear_kernel(w_ref, xt_ref, yt_ref):
    # w_ref : SMEM (4,) f32 = [W00, W01, W10, W11] for yT = W @ xT
    # xt_ref / yt_ref : VMEM (2, tb) blocks, batch on the lane axis.
    x0 = xt_ref[0:1, :]                       # (1, tb)
    x1 = xt_ref[1:2, :]                       # (1, tb)
    y0 = w_ref[0] * x0 + w_ref[1] * x1        # pure VPU work
    y1 = w_ref[2] * x0 + w_ref[3] * x1
    yt_ref[0:1, :] = y0.astype(yt_ref.dtype)  # lane-dense stores
    yt_ref[1:2, :] = y1.astype(yt_ref.dtype)


def two_linear(x, w1, w2, *, block_b=131072):
    """y = (x @ w1.T) @ w2.T for two bias-free layers, fused into one VPU kernel."""
    B, in_f = x.shape
    out_f = w2.shape[0]
    assert in_f == 2 and out_f == 2 and w1.shape == (3, 2) and w2.shape == (2, 3)

    # Fold the two layers (tiny (2,3)@(3,2) matmul in plain XLA, f32) and
    # flatten to 4 scalars that live in SMEM inside the kernel.
    w_flat = (w2.astype(jnp.float32) @ w1.astype(jnp.float32)).reshape(-1)  # (4,)

    # Transposed layout: batch on the last (128-lane) axis.
    xt = x.T  # (in_f, B)

    # Tile selection: lane-aligned tiles, >=2 grid steps when B is large so
    # dimension_semantics=("parallel",) can shard across v7x's two TensorCores,
    # capped at block_b so each step moves ~MiB of useful data while the
    # (sublane-padded) double-buffered blocks stay well inside 32 MiB VMEM.
    if B <= 2 * _LANE:
        tb = B                                            # tiny batch: one full block
    else:
        half = pl.cdiv(pl.cdiv(B, 2), _LANE) * _LANE      # ceil(B/2) rounded to 128
        tb = min(block_b, half)
    grid = (pl.cdiv(B, tb),)                              # masked tail block if needed

    cost = pl.CostEstimate(
        flops=6 * B,                                      # 4 mul + 2 add per row
        transcendentals=0,
        bytes_accessed=4 * (in_f + out_f) * B + 4 * int(w_flat.size),
    )

    yt = pl.pallas_call(
        _fused_linear_kernel,
        out_shape=jax.ShapeDtypeStruct((out_f, B), x.dtype),
        grid=grid,
        in_specs=[
            pl.BlockSpec(memory_space=pltpu.MemorySpace.SMEM),   # 4 weight scalars
            pl.BlockSpec((in_f, tb), lambda i: (0, i)),          # lane-dense activations
        ],
        out_specs=pl.BlockSpec((out_f, tb), lambda i: (0, i)),
        compiler_params=pltpu.CompilerParams(
            dimension_semantics=("parallel",),                   # batch axis
            vmem_limit_bytes=32 * 1024 * 1024,
        ),
        cost_estimate=cost,
    )(w_flat, xt)
    return yt.T                                                  # back to (B, out_f)


def init_params(key):
    # nn.Linear(2, 3, bias=False).reset_parameters(): kaiming-uniform,
    # i.e. U(-1/sqrt(fan_in), 1/sqrt(fan_in)) with fan_in = 2.
    bound1 = 1.0 / jnp.sqrt(2.0)
    w1 = jax.random.uniform(key, (3, 2), jnp.float32, minval=-bound1, maxval=bound1)
    # nn.Linear(3, 2, bias=False) with nn.init.zeros_ applied.
    w2 = jnp.zeros((2, 3), jnp.float32)
    return w1, w2


if __name__ == "__main__":
    # TODO(synk): the module's print() side-effects in forward() have no kernel
    # equivalent and are intentionally omitted.
    root = jax.random.PRNGKey(0)
    k_w, k_x, k_w2, k_xl = jax.random.split(root, 4)
    w1, w2 = init_params(k_w)

    batch = 8
    x = jax.random.normal(k_x, (batch, 2), jnp.float32)

    # Module semantics: layer2 is zero-initialized, so the forward output is zero.
    y = jax.block_until_ready(two_linear(x, w1, w2))
    ref = (x @ w1.T) @ w2.T
    assert y.shape == (batch, 2)
    assert jnp.allclose(y, ref, atol=1e-5), "mismatch vs reference (zero w2)"
    assert jnp.allclose(y, 0.0), "expected all-zero output (zero-init layer2)"

    # Non-degenerate second layer so a wrong fold / weight layout cannot hide
    # behind the zero init.
    bound2 = 1.0 / jnp.sqrt(3.0)
    w2_nz = jax.random.uniform(k_w2, (2, 3), jnp.float32,
                               minval=-bound2, maxval=bound2)
    y_nz = jax.block_until_ready(two_linear(x, w1, w2_nz))
    ref_nz = (x @ w1.T) @ w2_nz.T
    assert jnp.allclose(y_nz, ref_nz, atol=1e-5), "mismatch vs reference (nonzero w2)"

    # Exercise the multi-step lane-tiled grid + masked tail path (B not a
    # multiple of the tile) so the production-size code path is validated too.
    xl = jax.random.normal(k_xl, (1000, 2), jnp.float32)
    yl = jax.block_until_ready(two_linear(xl, w1, w2_nz, block_b=512))
    refl = (xl @ w1.T) @ w2_nz.T
    assert yl.shape == (1000, 2)
    assert jnp.allclose(yl, refl, atol=1e-5), "mismatch vs reference (tiled + tail)"

    print("KERNEL_OK")
</pallas_src>

<mosaic_0001>
module attributes {stable_mosaic.version = 11 : i64} {
  func.func @_fused_linear_kernel(%arg0: i32, %arg1: memref<4xf32, #tpu.memory_space<smem>>, %arg2: memref<2x8xf32, #tpu.memory_space<vmem>>, %arg3: memref<2x8xf32, #tpu.memory_space<vmem>>) attributes {dimension_semantics = [#tpu.dimension_semantics<parallel>], iteration_bounds = array<i64: 1>, scalar_prefetch = 0 : i64, scratch_operands = 0 : i64, tpu.core_type = #tpu.core_type<tc>, window_params = [{transform_indices = @transform_0, window_bounds = array<i64: 4>}, {transform_indices = @transform_1, window_bounds = array<i64: 2, 8>}, {transform_indices = @transform_2, window_bounds = array<i64: 2, 8>}]} {
    %c0 = arith.constant 0 : index
    %c0_0 = arith.constant 0 : index
    %0 = vector.load %arg2[%c0, %c0_0] : memref<2x8xf32, #tpu.memory_space<vmem>>, vector<1x8xf32>
    %c1 = arith.constant 1 : index
    %c0_1 = arith.constant 0 : index
    %1 = vector.load %arg2[%c1, %c0_1] : memref<2x8xf32, #tpu.memory_space<vmem>>, vector<1x8xf32>
    %c0_2 = arith.constant 0 : index
    %2 = memref.load %arg1[%c0_2] : memref<4xf32, #tpu.memory_space<smem>>
    %3 = vector.broadcast %2 : f32 to vector<1x8xf32>
    %4 = arith.mulf %3, %0 : vector<1x8xf32>
    %c1_3 = arith.constant 1 : index
    %5 = memref.load %arg1[%c1_3] : memref<4xf32, #tpu.memory_space<smem>>
    %6 = vector.broadcast %5 : f32 to vector<1x8xf32>
    %7 = arith.mulf %6, %1 : vector<1x8xf32>
    %8 = arith.addf %4, %7 : vector<1x8xf32>
    %c2 = arith.constant 2 : index
    %9 = memref.load %arg1[%c2] : memref<4xf32, #tpu.memory_space<smem>>
    %10 = vector.broadcast %9 : f32 to vector<1x8xf32>
    %11 = arith.mulf %10, %0 : vector<1x8xf32>
    %c3 = arith.constant 3 : index
    %12 = memref.load %arg1[%c3] : memref<4xf32, #tpu.memory_space<smem>>
    %13 = vector.broadcast %12 : f32 to vector<1x8xf32>
    %14 = arith.mulf %13, %1 : vector<1x8xf32>
    %15 = arith.addf %11, %14 : vector<1x8xf32>
    %c0_4 = arith.constant 0 : index
    %c0_5 = arith.constant 0 : index
    %16 = vector.load %arg3[%c0_4, %c0_5] : memref<2x8xf32, #tpu.memory_space<vmem>>, vector<1x8xf32>
    tpu.vector_store %arg3[%c0_4, %c0_5], %8 {strides = array<i32>} : memref<2x8xf32, #tpu.memory_space<vmem>>, vector<1x8xf32>,
    %c1_6 = arith.constant 1 : index
    %c0_7 = arith.constant 0 : index
    %17 = vector.load %arg3[%c1_6, %c0_7] : memref<2x8xf32, #tpu.memory_space<vmem>>, vector<1x8xf32>
    tpu.vector_store %arg3[%c1_6, %c0_7], %15 {strides = array<i32>} : memref<2x8xf32, #tpu.memory_space<vmem>>, vector<1x8xf32>,
    return
  }
  func.func @transform_0(%arg0: i32) -> i32 {
    %c0_i32 = arith.constant 0 : i32
    %c0_i32_0 = arith.constant 0 : i32
    return %c0_i32 : i32
  }
  func.func @transform_1(%arg0: i32) -> (i32, i32) {
    %c0_i32 = arith.constant 0 : i32
    %c0_i32_0 = arith.constant 0 : i32
    return %c0_i32, %arg0 : i32, i32
  }
  func.func @transform_2(%arg0: i32) -> (i32, i32) {
    %c0_i32 = arith.constant 0 : i32
    %c0_i32_0 = arith.constant 0 : i32
    return %c0_i32, %arg0 : i32, i32
  }
}

</mosaic_0001>

<bundles_post_ra>
// kernel: tpu_custom_call.1
= control target key start
LH: loop header
LB: loop body
LE: loop exit
PB: predicated region body
PF: predicated region fallthrough
CT: control target
= control target key end

     0   :  { %7 = vsyncpa [#allocation4], 0  ;;  %s145_s0 = inlined_call_operand.hbm [shape: f32[4], index: 0, kind: input, shape index: {}]   ;;  %s146_s1 = inlined_call_operand.vmem [shape: f32[2,8], index: 1, kind: input, shape index: {}]   ;;  %s147_s2 = inlined_call_operand.hbm [shape: f32[2,8], index: 2, kind: output, shape index: {}]  }
   0x1   :  { %8 = vsyncpa [#allocation3], 0  ;;  %s62_s11 = scalar_lea.hbm %s145_s0, 16 }
   0x2   :  { %p63_p0 = scmp.ne.s32.totalorder %s145_s0, %s62_s11  ;;  %p66_p1 = scmp.lt.u32.totalorder %s62_s11, %s145_s0 }
   0x4   :  { %p68_p2 = pnand %p66_p1, %p63_p0 }
   0x6   :  { %71 = shalt.err (!%p68_p2)
}
   0x7   :  { %s98_s16 = smov [#allocation2]  }
   0x8   :  { %16 = dma.hbm_to_smem %s145_s0, 16, %s98_s16, [#allocation4]  }
   0x9   :  { %94 = dma.done.wait [#allocation4], 16  }
   0xa   :  { %95 = vsyncadd [#allocation4], 4294967280 }
   0xb   :  { %22 = sfence }
   0xc   :  { %s25_s19 = sld [smem:[#allocation2]]  ;;  %s57_s20 = sld [smem:[#allocation2 + $0x1]]  ;;  %v23_v0 = vld [vmem:[%s146_s1] sm:$0x1]  ;;  %v24_v1 = vld [vmem:[%s146_s1 + $0x1] sm:$0x1] }
   0xd   :  { %s58_s21 = sld [smem:[#allocation2 + $0x2]]  ;;  %s59_s22 = sld [smem:[#allocation2 + $0x3]]  ;;  %vm39_vm0 = vcmask 57344  }
   0xe   :  { %s99_s0 = smov [#allocation5]  }
   0xf   :  { %s48_s27 = sshll.u32 %s99_s0, 4  ;;  %s49_s27 = int_to_ptr.vmem [resolvable:$true] %s48_s27 }
  0x10   :  { %s72_s28 = scalar_lea.vmem %s49_s27, 32  ;;  %p77_p4 = scmp.lt.s32.totalorder %s49_s27, %s49_s27 }
  0x11   :  { %p73_p3 = scmp.ne.s32.totalorder %s49_s27, %s72_s28  ;;  %p78_p5 = scmp.lt.s32.totalorder %s72_s28, %s72_s28 }
  0x12   :  { %v26_v2 = vstv %s25_s19  ;;  %v29_v4 = vstv %s57_s20 }
  0x13   :  { %v27_v3 = vmul.f32 %v26_v2, %v23_v0  ;;  %v33_v5 = vstv %s58_s21  ;;  %v30_v6 = vmul.f32 %v29_v4, %v24_v1  ;;  %v36_v8 = vstv %s59_s22  ;;  %p79_p6 = por %p78_p5, %p77_p4 }
  0x14   :  { %v34_v7 = vmul.f32 %v33_v5, %v23_v0  ;;  %v37_v9 = vmul.f32 %v36_v8, %v24_v1 }
  0x15   :  { %v31_v10 = vadd.f32 %v30_v6, %v27_v3  ;;  %p80_p7 = pnand %p79_p6, %p73_p3 }
  0x16   :  { %v38_v11 = vadd.f32 %v37_v9, %v34_v7 }
  0x17   :  { %40 = vst.msk [vmem:[#allocation5] sm:$0x1] %vm39_vm0, %v31_v10 }
  0x18   :  { %41 = vst.msk [vmem:[#allocation5 + $0x1] sm:$0x1] %vm39_vm0, %v38_v11 }
  0x19   :  { %83 = shalt.err (!%p80_p7)
}
  0x1a   :  { %s84_s30 = scalar_lea.hbm %s147_s2, 32 }
  0x1b   :  { %p85_p8 = scmp.ne.s32.totalorder %s147_s2, %s84_s30  ;;  %p88_p9 = scmp.lt.u32.totalorder %s84_s30, %s147_s2 }
  0x1d   :  { %p90_p10 = pnand %p88_p9, %p85_p8 }
  0x1f   :  { %93 = shalt.err (!%p90_p10)
}
  0x20   :  { %51 = dma.vmem_to_hbm [thread:$0]  %s49_s27, 32, %s147_s2, [#allocation3]  }
  0x21   :  { %96 = dma.done.wait [#allocation3], 32  }
  0x22   :  { %97 = vsyncadd [#allocation3], 4294967264 }
  0x23   :  { %55 = vsyncpa [#allocation3], 1 }
  0x24   :  { %56 = vsyncpa [#allocation4], 1 }

</bundles_post_ra>
